<compile_context>
chip_gen: v7x
topology: tpu7x:2x2x1
jax: 0.10.0
libtpu: 0.0.40
codegen_flags: <defaults>
</compile_context>

<pallas_src>
import jax
import jax.numpy as jnp
from jax.experimental import pallas as pl
from jax.experimental.pallas import tpu as pltpu


def testnet_kernel(scal_ref, x_ref, w_ref, out_ref):
    """One batch tile.

    scal_ref: SMEM f32[3] = [c, b_mu, b_scale]
    x_ref:    VMEM (tb, D)  activations, natural layout
    w_ref:    VMEM (D, 2)   col 0 = w_mu, col 1 = w_scale (resident)
    out_ref:  VMEM (tb, 3)  cols = [n, mu, scale]
    """
    c = scal_ref[0]
    b_mu = scal_ref[1]
    b_sc = scal_ref[2]

    # Both Linear(D -> 1) heads in ONE MXU contraction over D. The MXU is
    # otherwise idle here, and this frees the VPU/XLU slots the previous
    # broadcast-mul + sublane-reduce version burned.
    acc = jnp.dot(x_ref[...], w_ref[...],
                  preferred_element_type=jnp.float32)        # (tb, 2) f32

    mu = jnp.maximum(acc[:, 0:1] + b_mu, 0.0)                # ReLU head 0
    scale = jnp.maximum(acc[:, 1:2] + b_sc, 0.0)             # ReLU head 1
    n = mu + scale * c                                       # Levy combination

    out_ref[:, 0:1] = n
    out_ref[:, 1:2] = mu
    out_ref[:, 2:3] = scale


def _device_kind() -> str:
    try:
        return jax.devices()[0].device_kind.lower()
    except Exception:
        return ""


def testnet_forward(x, w_mu, b_mu, w_scale, b_scale, c_scalar, *,
                    target_block_bytes=None, min_pallas_batch=4096):
    """TestNet forward (use_levy=True).

    x: (B, D). w_mu / w_scale: (1, D). b_mu / b_scale / c_scalar: scalars.
    Returns (n, (mu, scale)), each (B, 1) float32 — same structure as the
    PyTorch module's forward.
    """
    x = jnp.asarray(x)
    B, D = x.shape
    compute_dtype = x.dtype                  # bf16 inputs stay bf16 (half the HBM read)
    itemsize = jnp.dtype(compute_dtype).itemsize

    # Stacked weights, shape (D, 2): col 0 = w_mu, col 1 = w_scale.
    w_stack = jnp.concatenate(
        [jnp.asarray(w_mu), jnp.asarray(w_scale)], axis=0).astype(compute_dtype).T

    c = jnp.asarray(c_scalar, jnp.float32).reshape(())
    bm = jnp.asarray(b_mu, jnp.float32).reshape(())
    bs = jnp.asarray(b_scale, jnp.float32).reshape(())

    # Small-batch fallback: below a few thousand rows the pallas_call is pure
    # launch + grid overhead versus a trivially fused XLA op.
    if B < min_pallas_batch:
        acc = jnp.dot(x.astype(jnp.float32), w_stack.astype(jnp.float32))
        mu = jnp.maximum(acc[:, 0:1] + bm, 0.0)
        scale = jnp.maximum(acc[:, 1:2] + bs, 0.0)
        return mu + scale * c, (mu, scale)

    kind = _device_kind()
    is_v7 = "7" in kind          # v7x: 2 TCs/chip, 64 MiB VMEM, ~3.2 TB/s HBM
    is_v5e = "v5" in kind        # v5e: 16 MiB scoped-VMEM default, ~0.82 TB/s HBM

    # Size the batch tile by BYTES of the x block (the only large stream):
    # per-grid-step overhead is ~0.35 us, so each step's DMA should be multi-MiB.
    # Bigger blocks on v7x (faster HBM), smaller on v5e.
    if target_block_bytes is None:
        target_block_bytes = (8 << 20) if is_v7 else ((2 << 20) if is_v5e else (4 << 20))
    rows = max(256, (target_block_bytes // (D * itemsize)) // 128 * 128)
    tb = B if B <= rows else rows            # full batch in one block, or row multiple of 128
    num_blocks = pl.cdiv(B, tb)              # last block may be partial; Pallas masks it

    # VMEM budget: x + out double-buffered. Default block sizes stay under every
    # generation's scoped default; only raise the limit for caller-requested
    # larger blocks (capped below v7x's 64 MiB physical VMEM).
    x_block_bytes = tb * D * itemsize
    out_block_bytes = tb * 3 * 4
    vmem_need = 2 * (x_block_bytes + out_block_bytes) + D * 2 * 4 + (1 << 20)
    vmem_limit = int(min(vmem_need * 3 // 2, 56 << 20)) if vmem_need > (12 << 20) else None

    # v7x: shard the batch grid across the chip's 2 TensorCores; harmless
    # "parallel" elsewhere (v5e/v6e have a single TC).
    batch_sem = pltpu.CORE_PARALLEL if (is_v7 and num_blocks >= 2) else "parallel"

    scalars = jnp.stack([c, bm, bs])         # one flat SMEM f32[3]: [c, b_mu, b_scale]

    out = pl.pallas_call(
        testnet_kernel,
        out_shape=jax.ShapeDtypeStruct((B, 3), jnp.float32),
        grid=(num_blocks,),
        in_specs=[
            pl.BlockSpec(memory_space=pltpu.SMEM),          # [c, b_mu, b_scale]
            pl.BlockSpec((tb, D), lambda i: (i, 0)),        # x batch tile, natural layout
            pl.BlockSpec((D, 2), lambda i: (0, 0)),         # stacked weights (resident)
        ],
        out_specs=pl.BlockSpec((tb, 3), lambda i: (i, 0)),  # cols = [n, mu, scale]
        compiler_params=pltpu.CompilerParams(
            dimension_semantics=(batch_sem,),
            vmem_limit_bytes=vmem_limit),
    )(scalars, x, w_stack)

    n = out[:, 0:1]
    mu = out[:, 1:2]
    scale = out[:, 2:3]
    return n, (mu, scale)


def _norm_ppf(p):
    # Inverse standard-normal CDF via erfinv (matches scipy.stats.norm.ppf).
    return jnp.sqrt(2.0) * jax.scipy.special.erfinv(2.0 * p - 1.0)


if __name__ == "__main__":
    key = jax.random.PRNGKey(0)
    k_x, k_wmu, k_wsc, k_bmu, k_bsc, k_u, k_x2 = jax.random.split(key, 7)

    B, D = 8, 32   # batch, input_size

    x = jax.random.normal(k_x, (B, D), dtype=jnp.float32)

    # nn.init.uniform_ on weights -> U(0, 1); biases keep PyTorch default
    # Linear init U(-1/sqrt(D), 1/sqrt(D)).
    w_mu = jax.random.uniform(k_wmu, (1, D), dtype=jnp.float32)
    w_scale = jax.random.uniform(k_wsc, (1, D), dtype=jnp.float32)
    bound = 1.0 / jnp.sqrt(jnp.float32(D))
    b_mu = jax.random.uniform(k_bmu, (), jnp.float32, minval=-bound, maxval=bound)
    b_scale = jax.random.uniform(k_bsc, (), jnp.float32, minval=-bound, maxval=bound)

    # Levy scalar: c = norm.ppf(1 - u)^(-2), u ~ U(0,1). Deterministic via PRNGKey(0).
    # NOTE: c is unbounded as u -> 0.5 (matches PyTorch semantics; no guard).
    u = jax.random.uniform(k_u, (), jnp.float32, minval=1e-6, maxval=1.0 - 1e-6)
    c = _norm_ppf(1.0 - u) ** (-2.0)

    def ref(xa):
        mu_r = jnp.maximum(xa @ w_mu.T + b_mu, 0.0)
        sc_r = jnp.maximum(xa @ w_scale.T + b_scale, 0.0)
        return mu_r + sc_r * c, mu_r, sc_r

    # (1) Small batch, single block — min_pallas_batch=0 forces the Pallas path.
    n_out, (mu_out, scale_out) = testnet_forward(
        x, w_mu, b_mu, w_scale, b_scale, c, min_pallas_batch=0)
    jax.block_until_ready((n_out, mu_out, scale_out))
    n_ref, mu_ref, sc_ref = ref(x)
    assert jnp.allclose(n_out, n_ref, atol=1e-4, rtol=1e-4)
    assert jnp.allclose(mu_out, mu_ref, atol=1e-4, rtol=1e-4)
    assert jnp.allclose(scale_out, sc_ref, atol=1e-4, rtol=1e-4)

    # (2) Multi-block grid with a partial final block (exercises tiling/masking).
    B2 = 2000
    x2 = jax.random.normal(k_x2, (B2, D), dtype=jnp.float32)
    n2, (mu2, sc2) = testnet_forward(
        x2, w_mu, b_mu, w_scale, b_scale, c,
        target_block_bytes=64 * 1024, min_pallas_batch=0)
    jax.block_until_ready((n2, mu2, sc2))
    n2_ref, mu2_ref, sc2_ref = ref(x2)
    assert jnp.allclose(n2, n2_ref, atol=1e-4, rtol=1e-4)
    assert jnp.allclose(mu2, mu2_ref, atol=1e-4, rtol=1e-4)
    assert jnp.allclose(sc2, sc2_ref, atol=1e-4, rtol=1e-4)

    print("KERNEL_OK")
</pallas_src>

<mosaic_0001>
module attributes {stable_mosaic.version = 11 : i64} {
  func.func @testnet_kernel(%arg0: i32, %arg1: memref<3xf32, #tpu.memory_space<smem>>, %arg2: memref<8x32xf32, #tpu.memory_space<vmem>>, %arg3: memref<32x2xf32, #tpu.memory_space<vmem>>, %arg4: memref<8x3xf32, #tpu.memory_space<vmem>>) attributes {dimension_semantics = [#tpu.dimension_semantics<parallel>], iteration_bounds = array<i64: 1>, scalar_prefetch = 0 : i64, scratch_operands = 0 : i64, tpu.core_type = #tpu.core_type<tc>, window_params = [{transform_indices = @transform_0, window_bounds = array<i64: 3>}, {transform_indices = @transform_1, window_bounds = array<i64: 8, 32>}, {pipeline_mode = #tpu.pipeline_mode<synchronous>, transform_indices = @transform_2, window_bounds = array<i64: 32, 2>}, {transform_indices = @transform_3, window_bounds = array<i64: 8, 3>}]} {
    %c0 = arith.constant 0 : index
    %0 = memref.load %arg1[%c0] : memref<3xf32, #tpu.memory_space<smem>>
    %c1 = arith.constant 1 : index
    %1 = memref.load %arg1[%c1] : memref<3xf32, #tpu.memory_space<smem>>
    %c2 = arith.constant 2 : index
    %2 = memref.load %arg1[%c2] : memref<3xf32, #tpu.memory_space<smem>>
    %c0_0 = arith.constant 0 : index
    %c0_1 = arith.constant 0 : index
    %3 = vector.load %arg2[%c0_0, %c0_1] : memref<8x32xf32, #tpu.memory_space<vmem>>, vector<8x32xf32>
    %c0_2 = arith.constant 0 : index
    %c0_3 = arith.constant 0 : index
    %4 = vector.load %arg3[%c0_2, %c0_3] : memref<32x2xf32, #tpu.memory_space<vmem>>, vector<32x2xf32>
    %cst = arith.constant dense<0.000000e+00> : vector<8x2xf32>
    %5 = tpu.matmul %3, %4, %cst {dimension_numbers = #tpu.dot_dimension_numbers<[1], [0], [0], [1], [0, 0, 1, 1], [], []>} : vector<8x32xf32>, vector<32x2xf32>, vector<8x2xf32> -> vector<8x2xf32>
    %6 = vector.extract_strided_slice %5 {offsets = [0, 0], sizes = [8, 1], strides = [1, 1]} : vector<8x2xf32> to vector<8x1xf32>
    %7 = vector.broadcast %1 : f32 to vector<8x1xf32>
    %8 = arith.addf %6, %7 : vector<8x1xf32>
    %cst_4 = arith.constant 0.000000e+00 : f32
    %9 = vector.broadcast %cst_4 : f32 to vector<8x1xf32>
    %10 = arith.maximumf %8, %9 : vector<8x1xf32>
    %11 = vector.extract_strided_slice %5 {offsets = [0, 1], sizes = [8, 1], strides = [1, 1]} : vector<8x2xf32> to vector<8x1xf32>
    %12 = vector.broadcast %2 : f32 to vector<8x1xf32>
    %13 = arith.addf %11, %12 : vector<8x1xf32>
    %cst_5 = arith.constant 0.000000e+00 : f32
    %14 = vector.broadcast %cst_5 : f32 to vector<8x1xf32>
    %15 = arith.maximumf %13, %14 : vector<8x1xf32>
    %16 = vector.broadcast %0 : f32 to vector<8x1xf32>
    %17 = arith.mulf %15, %16 : vector<8x1xf32>
    %18 = arith.addf %10, %17 : vector<8x1xf32>
    %c0_6 = arith.constant 0 : index
    %c0_7 = arith.constant 0 : index
    %19 = vector.load %arg4[%c0_6, %c0_7] : memref<8x3xf32, #tpu.memory_space<vmem>>, vector<8x1xf32>
    tpu.vector_store %arg4[%c0_6, %c0_7], %18 {strides = array<i32>} : memref<8x3xf32, #tpu.memory_space<vmem>>, vector<8x1xf32>,
    %c0_8 = arith.constant 0 : index
    %c1_9 = arith.constant 1 : index
    %20 = vector.load %arg4[%c0_8, %c1_9] : memref<8x3xf32, #tpu.memory_space<vmem>>, vector<8x1xf32>
    tpu.vector_store %arg4[%c0_8, %c1_9], %10 {strides = array<i32>} : memref<8x3xf32, #tpu.memory_space<vmem>>, vector<8x1xf32>,
    %c0_10 = arith.constant 0 : index
    %c2_11 = arith.constant 2 : index
    %21 = vector.load %arg4[%c0_10, %c2_11] : memref<8x3xf32, #tpu.memory_space<vmem>>, vector<8x1xf32>
    tpu.vector_store %arg4[%c0_10, %c2_11], %15 {strides = array<i32>} : memref<8x3xf32, #tpu.memory_space<vmem>>, vector<8x1xf32>,
    return
  }
  func.func @transform_0(%arg0: i32) -> i32 {
    %c0_i32 = arith.constant 0 : i32
    %c0_i32_0 = arith.constant 0 : i32
    return %c0_i32 : i32
  }
  func.func @transform_1(%arg0: i32) -> (i32, i32) {
    %c0_i32 = arith.constant 0 : i32
    %c0_i32_0 = arith.constant 0 : i32
    return %arg0, %c0_i32 : i32, i32
  }
  func.func @transform_2(%arg0: i32) -> (i32, i32) {
    %c0_i32 = arith.constant 0 : i32
    %c0_i32_0 = arith.constant 0 : i32
    %c0_i32_1 = arith.constant 0 : i32
    return %c0_i32, %c0_i32_0 : i32, i32
  }
  func.func @transform_3(%arg0: i32) -> (i32, i32) {
    %c0_i32 = arith.constant 0 : i32
    %c0_i32_0 = arith.constant 0 : i32
    return %arg0, %c0_i32 : i32, i32
  }
}

</mosaic_0001>

<bundles_post_ra>
// kernel: tpu_custom_call.1
= control target key start
LH: loop header
LB: loop body
LE: loop exit
PB: predicated region body
PF: predicated region fallthrough
CT: control target
= control target key end

     0   :  { %8 = vsyncpa [#allocation3], 0  ;;  %s239_s0 = inlined_call_operand.vmem [shape: f32[3], index: 0, kind: input, shape index: {}]   ;;  %s240_s1 = inlined_call_operand.vmem [shape: f32[8,32], index: 1, kind: input, shape index: {}]   ;;  %s241_s2 = inlined_call_operand.vmem [shape: f32[32,2], index: 2, kind: input, shape index: {}]   ;;  %s242_s3 = inlined_call_operand.vmem [shape: f32[8,3], index: 3, kind: output, shape index: {}]  }
   0x1   :  { %s15_s14 = sshll.u32 %s239_s0, 4  ;;  %s16_s14 = int_to_ptr.vmem [resolvable:$true] %s15_s14 }
   0x2   :  { %s172_s15 = scalar_lea.vmem %s16_s14, 16  ;;  %p177_p1 = scmp.lt.s32.totalorder %s16_s14, %s16_s14 }
   0x3   :  { %p173_p0 = scmp.ne.s32.totalorder %s16_s14, %s172_s15  ;;  %p178_p2 = scmp.lt.s32.totalorder %s172_s15, %s172_s15 }
   0x5   :  { %p179_p3 = por %p178_p2, %p177_p1 }
   0x7   :  { %p180_p4 = pnand %p179_p3, %p173_p0 }
   0x9   :  { %183 = shalt.err (!%p180_p4)
}
   0xa   :  { %s186_s16 = smov [#allocation2]  }
   0xb   :  { %18 = dma.vmem_to_smem %s16_s14, 16, %s186_s16, [#allocation3]  }
   0xc   :  { %184 = dma.done.wait [#allocation3], 16  }
   0xd   :  { %185 = vsyncadd [#allocation3], 4294967280 }
   0xe   :  { %26 = sfence }
   0xf   :  { %v31_v0 = vld [vmem:[%s241_s2] sm:$0xff]  ;;  %v32_v1 = vld [vmem:[%s241_s2 + $0x8] sm:$0xff]  ;;  %v33_v2 = vld [vmem:[%s241_s2 + $0x10] sm:$0xff]  ;;  %v187_v3 = vmov 0.0|0.0   ;;  %vm188_vm0 = vmmov 0   ;;  %v189_v6 = vmov 0.0  }
  0x10   :  { %160 = vmatprep.subr.bf16.mxu0 %v187_v3  ;;  %v161_v4 = vpack.c.bf16 %v32_v1, %v31_v0  ;;  %v34_v5 = vld [vmem:[%s241_s2 + $0x18] sm:$0xff]  ;;  %157 = vmatprep.mubr.msk.f32.mxu0 %vm188_vm0, %v189_v6  ;;  %v30_v8 = vld [vmem:[%s240_s1] sm:$0xff]  ;;  %vm35_vm1 = vcmask 261120   ;;  %s142_s26 = sld [smem:[#allocation2 + $0x2]]  ;;  %s141_s27 = sld [smem:[#allocation2 + $0x1]]  ;;  %vm122_vm2 = vcmask 7168  }
  0x11   :  { %v164_v7 = vpack.c.bf16 %v34_v5, %v33_v2  ;;  %s27_s28 = sld [smem:[#allocation2]]  ;;  %s190_s2 = smov 1   ;;  %vm128_vm3 = vcmask 15368   ;;  %vm134_vm4 = vcmask 23568  }
  0x12   :  { %162 = vmatpush3.bf16.msra.mxu0 %v161_v4  ;;  %s191_s29 = smov 127  }
  0x13   :  { %163 = vmatprep.subr.bf16.mxu0 %v187_v3 }
  0x16   :  { %165 = vmatpush3.bf16.msra.mxu0 %v164_v7  ;;  %v112_v9 = vstv %s142_s26  ;;  %v109_v13 = vstv %s141_s27 }
  0x17   :  { %v115_v14 = vstv %s27_s28 }
  0x19   :  { %158 = vmatmul.mubr.msk.f32.vlgmr.msra.gmra.mrb[0].mxu0 %vm35_vm1, %v30_v8 }
  0xec   :  { %v105_v10 = vpop.f32.mrb[0].mxu0 }
  0xed   :  { %v113_v11 = vadd.f32 %v112_v9, %v105_v10  ;;  %v159_v12 = vpop.f32.mrb[1].mxu0  ;;  %v110_v16 = vadd.f32 %v109_v13, %v105_v10 }
  0xef   :  { %v114_v15 = vmax.f32 %v113_v11, 0.0  ;;  %v111_v18 = vmax.f32 %v110_v16, 0.0 }
  0xf1   :  { %131 = vrot.lane.b32.xlu1 %v114_v15, %s190_s2  ;;  %v116_v17 = vmul.f32 %v115_v14, %v114_v15 }
  0xf3   :  { %118 = vrot.lane.b32.xlu0 %v116_v17, %s191_s29 }
  0xf7   :  { %125 = vrot.lane.b32.xlu0 %v111_v18, %s190_s2 }
 0x163   :  { %v132_v22 = vpop.permute.xlu1 %131 }
 0x165   :  { %v119_v19 = vpop.permute.xlu0 %118 }
 0x166   :  { %v121_v20 = vadd.f32 %v119_v19, %v111_v18 }
 0x168   :  { %123 = vst.msk [vmem:[%s242_s3] sm:$0xff] %vm122_vm2, %v121_v20 }
 0x169   :  { %v126_v21 = vpop.permute.xlu0 %125 }
 0x16a   :  { %129 = vst.msk [vmem:[%s242_s3] sm:$0xff] %vm128_vm3, %v126_v21 }
 0x16b   :  { %135 = vst.msk [vmem:[%s242_s3] sm:$0xff] %vm134_vm4, %v132_v22 }
 0x16c   :  { %140 = vsyncpa [#allocation3], 1 }

</bundles_post_ra>
